<compile_context>
chip_gen: v7x
topology: tpu7x:2x2x1
jax: 0.10.0
libtpu: 0.0.40
codegen_flags: <defaults>
</compile_context>

<pallas_src>
import jax
import jax.numpy as jnp
import numpy as np
from jax.experimental import pallas as pl
from jax.experimental.pallas import tpu as pltpu


def ffn_fusion_kernel(z_ref, zf_ref, w1_ref, b1_ref, w2_ref, b2_ref, o_ref):
    # MXU: zf @ W1 (bf16 operands, f32 accumulation).
    h = jnp.dot(zf_ref[...], w1_ref[...], preferred_element_type=jnp.float32)
    # VPU (f32): bias + ReLU.
    h = jnp.maximum(h + b1_ref[...], 0.0)
    # MXU: h @ W2 (cast h down only at the dot input).
    y = jnp.dot(h.astype(w2_ref.dtype), w2_ref[...],
                preferred_element_type=jnp.float32) + b2_ref[...]
    # VPU (f32): residual add, then cast to the output dtype.
    o_ref[...] = (z_ref[...] + y).astype(o_ref.dtype)


def _round_up(x, m):
    return (x + m - 1) // m * m


def temporal_ensemble_with_fusion(Z, Z_fused, W1, b1, W2, b2,
                                  tm=512,
                                  matmul_dtype=jnp.bfloat16,
                                  vmem_budget_bytes=48 * 1024 * 1024):
    """Z, Z_fused: (..., D). W1, W2: (D, D) stored as [in, out]. b1, b2: (D,)."""
    orig_shape = Z.shape
    D = orig_shape[-1]
    out_dtype = Z.dtype

    # Residual path stays f32; matmul operands use matmul_dtype (bf16 default).
    Zr = Z.reshape(-1, D).astype(jnp.float32)
    Zf = Z_fused.reshape(-1, D).astype(matmul_dtype)
    W1m = W1.astype(matmul_dtype)
    W2m = W2.astype(matmul_dtype)
    b1r = b1.reshape(1, D).astype(jnp.float32)
    b2r = b2.reshape(1, D).astype(jnp.float32)
    M = Zr.shape[0]

    # ---- lane-dense feature dim: zero-pad D up to a multiple of 128 ----------
    # Zero padding is exact: padded input lanes hit zero weight rows/cols and
    # zero biases, so the first D output lanes are unchanged.
    Dp = _round_up(D, 128)
    if Dp != D:
        pd = Dp - D
        Zr = jnp.pad(Zr, ((0, 0), (0, pd)))
        Zf = jnp.pad(Zf, ((0, 0), (0, pd)))
        W1m = jnp.pad(W1m, ((0, pd), (0, pd)))
        W2m = jnp.pad(W2m, ((0, pd), (0, pd)))
        b1r = jnp.pad(b1r, ((0, 0), (0, pd)))
        b2r = jnp.pad(b2r, ((0, 0), (0, pd)))

    # ---- pick the row tile: largest multiple of 8 that fits the VMEM budget --
    mm_bytes = np.dtype(matmul_dtype).itemsize
    # Resident weights/biases (default pipeline keeps 2 buffers per operand).
    resident = 2 * (2 * Dp * Dp * mm_bytes + 2 * Dp * 4)
    # Per-row cost of the row-tiled operands, double buffered:
    #   Z tile (f32) + Z_fused tile (matmul dtype) + out tile (f32).
    per_row = 2 * Dp * (4 + mm_bytes + 4)
    budget = (vmem_budget_bytes * 3) // 4  # headroom for compiler scratch/sems
    if budget > resident:
        tm_cap = max(8, ((budget - resident) // per_row) // 8 * 8)
    else:
        # TODO(synk): for very large D (weights alone exceed VMEM, e.g. on
        # v7x's 64 MiB) add an explicit K/N tiling of W1/W2 with a reduction
        # grid axis instead of keeping them fully resident.
        tm_cap = 8
    tm_eff = int(min(tm, tm_cap, _round_up(M, 8)))
    tm_eff = max(8, (tm_eff // 8) * 8)

    # ---- pad rows to a multiple of the row tile (no divisibility assert) -----
    Mp = _round_up(M, tm_eff)
    if Mp != M:
        Zr = jnp.pad(Zr, ((0, Mp - M), (0, 0)))
        Zf = jnp.pad(Zf, ((0, Mp - M), (0, 0)))

    out = pl.pallas_call(
        ffn_fusion_kernel,
        out_shape=jax.ShapeDtypeStruct((Mp, Dp), jnp.float32),
        grid_spec=pltpu.PrefetchScalarGridSpec(
            num_scalar_prefetch=0,
            grid=(Mp // tm_eff,),
            in_specs=[
                pl.BlockSpec((tm_eff, Dp), lambda i: (i, 0)),  # Z rows (f32)
                pl.BlockSpec((tm_eff, Dp), lambda i: (i, 0)),  # Z_fused rows
                pl.BlockSpec((Dp, Dp), lambda i: (0, 0)),      # W1 (resident)
                pl.BlockSpec((1, Dp), lambda i: (0, 0)),       # b1
                pl.BlockSpec((Dp, Dp), lambda i: (0, 0)),      # W2 (resident)
                pl.BlockSpec((1, Dp), lambda i: (0, 0)),       # b2
            ],
            out_specs=pl.BlockSpec((tm_eff, Dp), lambda i: (i, 0)),
        ),
        compiler_params=pltpu.CompilerParams(
            dimension_semantics=("parallel",),      # row axis shards across TCs
            vmem_limit_bytes=vmem_budget_bytes,
        ),
        input_output_aliases={0: 0},                # reuse padded-Z buffer
    )(Zr, Zf, W1m, b1r, W2m, b2r)

    out = out[:M, :D].astype(out_dtype)
    return out.reshape(orig_shape)


def reference(Z, Z_fused, W1, b1, W2, b2):
    h = jnp.maximum(Z_fused @ W1 + b1, 0.0)
    return Z + (h @ W2 + b2)


if __name__ == "__main__":
    batch, seq, hidden = 2, 8, 32  # input_dim = hidden
    key = jax.random.PRNGKey(0)
    kz, kzf, kw1, kb1, kw2, kb2 = jax.random.split(key, 6)

    Z = jax.random.normal(kz, (batch, seq, hidden), dtype=jnp.float32)
    Z_fused = jax.random.normal(kzf, (batch, seq, hidden), dtype=jnp.float32)

    # Deterministic parameter init (Kaiming-uniform-ish bound, like nn.Linear).
    bound = 1.0 / (hidden ** 0.5)
    W1 = jax.random.uniform(kw1, (hidden, hidden), jnp.float32, -bound, bound)
    b1 = jax.random.uniform(kb1, (hidden,), jnp.float32, -bound, bound)
    W2 = jax.random.uniform(kw2, (hidden, hidden), jnp.float32, -bound, bound)
    b2 = jax.random.uniform(kb2, (hidden,), jnp.float32, -bound, bound)

    ref = reference(Z, Z_fused, W1, b1, W2, b2)

    # Fast path: bf16 MXU operands, f32 accumulation/elementwise.
    out = temporal_ensemble_with_fusion(Z, Z_fused, W1, b1, W2, b2)
    out = jax.block_until_ready(out)
    assert out.shape == Z.shape
    assert jnp.allclose(out, ref, atol=5e-2, rtol=5e-2)  # bf16 matmul tolerance

    # Exact path: f32 matmul operands, checks padding/tiling logic tightly.
    out_f32 = temporal_ensemble_with_fusion(Z, Z_fused, W1, b1, W2, b2,
                                            matmul_dtype=jnp.float32)
    out_f32 = jax.block_until_ready(out_f32)
    assert jnp.allclose(out_f32, ref, atol=1e-5, rtol=1e-5)

    print("KERNEL_OK")
</pallas_src>

<mosaic_0001>
module attributes {stable_mosaic.version = 11 : i64} {
  func.func @ffn_fusion_kernel(%arg0: i32, %arg1: memref<16x128xf32, #tpu.memory_space<vmem>>, %arg2: memref<16x128xbf16, #tpu.memory_space<vmem>>, %arg3: memref<128x128xbf16, #tpu.memory_space<vmem>>, %arg4: memref<1x128xf32, #tpu.memory_space<vmem>>, %arg5: memref<128x128xbf16, #tpu.memory_space<vmem>>, %arg6: memref<1x128xf32, #tpu.memory_space<vmem>>, %arg7: memref<16x128xf32, #tpu.memory_space<vmem>>) attributes {dimension_semantics = [#tpu.dimension_semantics<parallel>], iteration_bounds = array<i64: 1>, scalar_prefetch = 0 : i64, scratch_operands = 0 : i64, tpu.core_type = #tpu.core_type<tc>, window_params = [{transform_indices = @transform_0, window_bounds = array<i64: 16, 128>}, {transform_indices = @transform_1, window_bounds = array<i64: 16, 128>}, {pipeline_mode = #tpu.pipeline_mode<synchronous>, transform_indices = @transform_2, window_bounds = array<i64: 128, 128>}, {pipeline_mode = #tpu.pipeline_mode<synchronous>, transform_indices = @transform_3, window_bounds = array<i64: 1, 128>}, {pipeline_mode = #tpu.pipeline_mode<synchronous>, transform_indices = @transform_4, window_bounds = array<i64: 128, 128>}, {pipeline_mode = #tpu.pipeline_mode<synchronous>, transform_indices = @transform_5, window_bounds = array<i64: 1, 128>}, {transform_indices = @transform_6, window_bounds = array<i64: 16, 128>}]} {
    %c0 = arith.constant 0 : index
    %c0_0 = arith.constant 0 : index
    %0 = vector.load %arg2[%c0, %c0_0] : memref<16x128xbf16, #tpu.memory_space<vmem>>, vector<16x128xbf16>
    %c0_1 = arith.constant 0 : index
    %c0_2 = arith.constant 0 : index
    %1 = vector.load %arg3[%c0_1, %c0_2] : memref<128x128xbf16, #tpu.memory_space<vmem>>, vector<128x128xbf16>
    %cst = arith.constant dense<0.000000e+00> : vector<16x128xf32>
    %2 = tpu.matmul %0, %1, %cst {dimension_numbers = #tpu.dot_dimension_numbers<[1], [0], [0], [1], [0, 0, 1, 1], [], []>} : vector<16x128xbf16>, vector<128x128xbf16>, vector<16x128xf32> -> vector<16x128xf32>
    %c0_3 = arith.constant 0 : index
    %c0_4 = arith.constant 0 : index
    %3 = vector.load %arg4[%c0_3, %c0_4] : memref<1x128xf32, #tpu.memory_space<vmem>>, vector<1x128xf32>
    %4 = vector.broadcast %3 : vector<1x128xf32> to vector<16x128xf32>
    %5 = arith.addf %2, %4 : vector<16x128xf32>
    %cst_5 = arith.constant 0.000000e+00 : f32
    %6 = vector.broadcast %cst_5 : f32 to vector<16x128xf32>
    %7 = arith.maximumf %5, %6 : vector<16x128xf32>
    %8 = arith.truncf %7 : vector<16x128xf32> to vector<16x128xbf16>
    %c0_6 = arith.constant 0 : index
    %c0_7 = arith.constant 0 : index
    %9 = vector.load %arg5[%c0_6, %c0_7] : memref<128x128xbf16, #tpu.memory_space<vmem>>, vector<128x128xbf16>
    %cst_8 = arith.constant dense<0.000000e+00> : vector<16x128xf32>
    %10 = tpu.matmul %8, %9, %cst_8 {dimension_numbers = #tpu.dot_dimension_numbers<[1], [0], [0], [1], [0, 0, 1, 1], [], []>} : vector<16x128xbf16>, vector<128x128xbf16>, vector<16x128xf32> -> vector<16x128xf32>
    %c0_9 = arith.constant 0 : index
    %c0_10 = arith.constant 0 : index
    %11 = vector.load %arg6[%c0_9, %c0_10] : memref<1x128xf32, #tpu.memory_space<vmem>>, vector<1x128xf32>
    %12 = vector.broadcast %11 : vector<1x128xf32> to vector<16x128xf32>
    %13 = arith.addf %10, %12 : vector<16x128xf32>
    %c0_11 = arith.constant 0 : index
    %c0_12 = arith.constant 0 : index
    %14 = vector.load %arg1[%c0_11, %c0_12] : memref<16x128xf32, #tpu.memory_space<vmem>>, vector<16x128xf32>
    %15 = arith.addf %14, %13 : vector<16x128xf32>
    %c0_13 = arith.constant 0 : index
    %c0_14 = arith.constant 0 : index
    %16 = vector.load %arg7[%c0_13, %c0_14] : memref<16x128xf32, #tpu.memory_space<vmem>>, vector<16x128xf32>
    tpu.vector_store %arg7[%c0_13, %c0_14], %15 {strides = array<i32>} : memref<16x128xf32, #tpu.memory_space<vmem>>, vector<16x128xf32>,
    return
  }
  func.func @transform_0(%arg0: i32) -> (i32, i32) {
    %c0_i32 = arith.constant 0 : i32
    %c0_i32_0 = arith.constant 0 : i32
    return %arg0, %c0_i32 : i32, i32
  }
  func.func @transform_1(%arg0: i32) -> (i32, i32) {
    %c0_i32 = arith.constant 0 : i32
    %c0_i32_0 = arith.constant 0 : i32
    return %arg0, %c0_i32 : i32, i32
  }
  func.func @transform_2(%arg0: i32) -> (i32, i32) {
    %c0_i32 = arith.constant 0 : i32
    %c0_i32_0 = arith.constant 0 : i32
    %c0_i32_1 = arith.constant 0 : i32
    return %c0_i32, %c0_i32_0 : i32, i32
  }
  func.func @transform_3(%arg0: i32) -> (i32, i32) {
    %c0_i32 = arith.constant 0 : i32
    %c0_i32_0 = arith.constant 0 : i32
    %c0_i32_1 = arith.constant 0 : i32
    return %c0_i32, %c0_i32_0 : i32, i32
  }
  func.func @transform_4(%arg0: i32) -> (i32, i32) {
    %c0_i32 = arith.constant 0 : i32
    %c0_i32_0 = arith.constant 0 : i32
    %c0_i32_1 = arith.constant 0 : i32
    return %c0_i32, %c0_i32_0 : i32, i32
  }
  func.func @transform_5(%arg0: i32) -> (i32, i32) {
    %c0_i32 = arith.constant 0 : i32
    %c0_i32_0 = arith.constant 0 : i32
    %c0_i32_1 = arith.constant 0 : i32
    return %c0_i32, %c0_i32_0 : i32, i32
  }
  func.func @transform_6(%arg0: i32) -> (i32, i32) {
    %c0_i32 = arith.constant 0 : i32
    %c0_i32_0 = arith.constant 0 : i32
    return %arg0, %c0_i32 : i32, i32
  }
}

</mosaic_0001>

<bundles_post_ra>
// kernel: tpu_custom_call.1
= control target key start
LH: loop header
LB: loop body
LE: loop exit
PB: predicated region body
PF: predicated region fallthrough
CT: control target
= control target key end

     0   :  { %11 = vsyncpa [#allocation3], 0  ;;  %s637_s0 = inlined_call_operand.hbm [shape: f32[16,128], index: 0, kind: input, shape index: {}, may-alias: {0,6}]   ;;  %s638_s1 = inlined_call_operand.vmem [shape: bf16[16,128], index: 1, kind: input, shape index: {}]   ;;  %s639_s2 = inlined_call_operand.hbm [shape: bf16[128,128], index: 2, kind: input, shape index: {}]   ;;  %s640_s3 = inlined_call_operand.vmem [shape: f32[1,128], index: 3, kind: input, shape index: {}]   ;;  %s641_s4 = inlined_call_operand.hbm [shape: bf16[128,128], index: 4, kind: input, shape index: {}]   ;;  %s642_s5 = inlined_call_operand.vmem [shape: f32[1,128], index: 5, kind: input, shape index: {}]   ;;  %s643_s6 = inlined_call_operand.hbm [shape: f32[16,128], index: 6, kind: output, shape index: {}, may-alias: {0,6}]  }
   0x1   :  { %12 = vsyncpa [#allocation6], 0 }
   0x2   :  { %13 = vsyncpa [#allocation4], 0  ;;  %s523_s21 = smov [#allocation5]   ;;  %s429_s25 = scalar_lea.hbm %s639_s2, 1024 }
   0x3   :  { %s33_s22 = sshll.u32 %s523_s21, 4  ;;  %p430_p0 = scmp.ne.s32.totalorder %s639_s2, %s429_s25  ;;  %s34_s22 = int_to_ptr.vmem [resolvable:$true] %s33_s22 }
   0x4   :  { %p433_p1 = scmp.lt.u32.totalorder %s429_s25, %s639_s2 }
   0x6   :  { %p435_p2 = pnand %p433_p1, %p430_p0 }
   0x8   :  { %438 = shalt.err (!%p435_p2)
}
   0x9   :  { %s439_s30 = scalar_lea.vmem %s34_s22, 1024  ;;  %p444_p4 = scmp.lt.s32.totalorder %s34_s22, %s34_s22 }
   0xa   :  { %p440_p3 = scmp.ne.s32.totalorder %s34_s22, %s439_s30  ;;  %p445_p5 = scmp.lt.s32.totalorder %s439_s30, %s439_s30 }
   0xc   :  { %p446_p6 = por %p445_p5, %p444_p4 }
   0xe   :  { %p447_p7 = pnand %p446_p6, %p440_p3 }
  0x10   :  { %450 = shalt.err (!%p447_p7)
}
  0x11   :  { %s524_s7 = smov 64   ;;  %s525_s8 = smov 4  }
  0x12   :  { %39 = dma.hbm_to_vmem [thread:$0]  %s639_s2, 1024, %s34_s22, [#allocation6], %s524_s7, %s524_s7, %s525_s8  }
  0x13   :  { %s526_s11 = smov [#allocation2]   ;;  %s451_s15 = scalar_lea.hbm %s637_s0, 256 }
  0x14   :  { %s19_s12 = sshll.u32 %s526_s11, 4  ;;  %p452_p8 = scmp.ne.s32.totalorder %s637_s0, %s451_s15  ;;  %s20_s12 = int_to_ptr.vmem [resolvable:$true] %s19_s12 }
  0x15   :  { %p455_p9 = scmp.lt.u32.totalorder %s451_s15, %s637_s0 }
  0x17   :  { %p457_p10 = pnand %p455_p9, %p452_p8 }
  0x19   :  { %460 = shalt.err (!%p457_p10)
}
  0x1a   :  { %s461_s20 = scalar_lea.vmem %s20_s12, 256  ;;  %p466_p12 = scmp.lt.s32.totalorder %s20_s12, %s20_s12 }
  0x1b   :  { %p462_p11 = scmp.ne.s32.totalorder %s20_s12, %s461_s20  ;;  %p467_p13 = scmp.lt.s32.totalorder %s461_s20, %s461_s20 }
  0x1d   :  { %p468_p0 = por %p467_p13, %p466_p12 }
  0x1f   :  { %p469_p1 = pnand %p468_p0, %p462_p11 }
  0x21   :  { %472 = shalt.err (!%p469_p1)
}
  0x22   :  { %s527_s2 = smov 128   ;;  %s528_s21 = smov 8  }
  0x23   :  { %25 = dma.hbm_to_vmem [thread:$0]  %s637_s0, 256, %s20_s12, [#allocation3], %s527_s2, %s527_s2, %s528_s21  }
  0x24   :  { %s529_s24 = smov [#allocation7]   ;;  %s473_s28 = scalar_lea.hbm %s641_s4, 1024 }
  0x25   :  { %s47_s25 = sshll.u32 %s529_s24, 4  ;;  %p474_p2 = scmp.ne.s32.totalorder %s641_s4, %s473_s28  ;;  %s48_s25 = int_to_ptr.vmem [resolvable:$true] %s47_s25 }
  0x26   :  { %p477_p3 = scmp.lt.u32.totalorder %s473_s28, %s641_s4 }
  0x28   :  { %p479_p4 = pnand %p477_p3, %p474_p2 }
  0x2a   :  { %482 = shalt.err (!%p479_p4)
}
  0x2b   :  { %s483_s11 = scalar_lea.vmem %s48_s25, 1024  ;;  %p488_p6 = scmp.lt.s32.totalorder %s48_s25, %s48_s25 }
  0x2c   :  { %p484_p5 = scmp.ne.s32.totalorder %s48_s25, %s483_s11  ;;  %p489_p7 = scmp.lt.s32.totalorder %s483_s11, %s483_s11 }
  0x2e   :  { %p490_p8 = por %p489_p7, %p488_p6 }
  0x30   :  { %p491_p9 = pnand %p490_p8, %p484_p5 }
  0x32   :  { %494 = shalt.err (!%p491_p9)
}
  0x33   :  { %53 = dma.hbm_to_vmem [thread:$0]  %s641_s4, 1024, %s48_s25, [#allocation6], %s524_s7, %s524_s7, %s525_s8  }
  0x34   :  { %517 = dma.done.wait [#allocation3], 256  }
  0x35   :  { %518 = vsyncadd [#allocation3], 4294967040 }
  0x36   :  { %519 = dma.done.wait [#allocation6], 2048  }
  0x37   :  { %520 = vsyncadd [#allocation6], 4294965248  ;;  %v530_v0 = vmov 0.0   ;;  %vm531_vm0 = vmmov 0   ;;  %v412_v1 = vld [vmem:[#allocation5] sm:$0xff]   ;;  %v413_v2 = vld [vmem:[#allocation5 + $0x8] sm:$0xff]  }
  0x38   :  { %362 = vmatprep.subr.bf16.mxu0 %v530_v0  ;;  %378 = vmatprep.mubr.msk.bf16.mxu0 %vm531_vm0, %v530_v0  ;;  %v414_v3 = vld [vmem:[#allocation5 + $0x10] sm:$0xff]   ;;  %v421_v4 = vld [vmem:[#allocation7] sm:$0xff]   ;;  %v415_v5 = vld [vmem:[#allocation5 + $0x18] sm:$0xff]  }
  0x39   :  { %382 = vmatprep.subr.bf16.mxu1 %v530_v0  ;;  %398 = vmatprep.mubr.msk.bf16.mxu1 %vm531_vm0, %v530_v0  ;;  %v422_v6 = vld [vmem:[#allocation7 + $0x8] sm:$0xff]   ;;  %v416_v7 = vld [vmem:[#allocation5 + $0x20] sm:$0xff]   ;;  %v423_v8 = vld [vmem:[#allocation7 + $0x10] sm:$0xff]  }
  0x3a   :  { %363 = vmatpush3.bf16.msra.mxu0 %v412_v1  ;;  %383 = vmatpush3.bf16.msra.mxu1 %v421_v4  ;;  %v417_v9 = vld [vmem:[#allocation5 + $0x28] sm:$0xff]   ;;  %v424_v10 = vld [vmem:[#allocation7 + $0x18] sm:$0xff]   ;;  %v418_v11 = vld [vmem:[#allocation5 + $0x30] sm:$0xff]  }
  0x3b   :  { %364 = vmatprep.subr.bf16.mxu0 %v530_v0  ;;  %384 = vmatprep.subr.bf16.mxu1 %v530_v0  ;;  %v425_v12 = vld [vmem:[#allocation7 + $0x20] sm:$0xff]   ;;  %v419_v13 = vld [vmem:[#allocation5 + $0x38] sm:$0xff]   ;;  %v426_v14 = vld [vmem:[#allocation7 + $0x28] sm:$0xff]  }
  0x3c   :  { %v420_v15 = vld [vmem:[%s638_s1] sm:$0xff]   ;;  %v428_v17 = vld [vmem:[#allocation7 + $0x38] sm:$0xff]  }
  0x3d   :  { %v427_v16 = vld [vmem:[#allocation7 + $0x30] sm:$0xff]   ;;  %v302_v34 = vld [vmem:[#allocation2 + $0x8] sm:$0xff] }
  0x3e   :  { %365 = vmatpush3.bf16.msra.mxu0 %v413_v2  ;;  %385 = vmatpush3.bf16.msra.mxu1 %v422_v6  ;;  %v325_v18 = vld [vmem:[%s640_s3] ss:$0 sm:$0xff]  ;;  %s532_s3 = smov [#allocation8]  }
  0x3f   :  { %366 = vmatprep.subr.bf16.mxu0 %v530_v0  ;;  %386 = vmatprep.subr.bf16.mxu1 %v530_v0  ;;  %v335_v28 = vld [vmem:[%s642_s5] ss:$0 sm:$0xff]  ;;  %s312_s15 = sshll.u32 %s532_s3, 4  ;;  %s313_s15 = int_to_ptr.vmem [resolvable:$true] %s312_s15 }
  0x40   :  { %v301_v30 = vld [vmem:[#allocation2] sm:$0xff]  ;;  %s495_s16 = scalar_lea.vmem %s313_s15, 256  ;;  %p500_p11 = scmp.lt.s32.totalorder %s313_s15, %s313_s15 }
  0x41   :  { %p496_p10 = scmp.ne.s32.totalorder %s313_s15, %s495_s16  ;;  %p501_p12 = scmp.lt.s32.totalorder %s495_s16, %s495_s16 }
  0x42   :  { %367 = vmatpush3.bf16.msra.mxu0 %v414_v3  ;;  %387 = vmatpush3.bf16.msra.mxu1 %v423_v8 }
  0x43   :  { %368 = vmatprep.subr.bf16.mxu0 %v530_v0  ;;  %388 = vmatprep.subr.bf16.mxu1 %v530_v0  ;;  %p502_p13 = por %p501_p12, %p500_p11 }
  0x45   :  { %p503_p0 = pnand %p502_p13, %p496_p10 }
  0x46   :  { %369 = vmatpush3.bf16.msra.mxu0 %v415_v5  ;;  %389 = vmatpush3.bf16.msra.mxu1 %v424_v10 }
  0x47   :  { %370 = vmatprep.subr.bf16.mxu0 %v530_v0  ;;  %390 = vmatprep.subr.bf16.mxu1 %v530_v0 }
  0x4a   :  { %371 = vmatpush3.bf16.msra.mxu0 %v416_v7  ;;  %391 = vmatpush3.bf16.msra.mxu1 %v425_v12 }
  0x4b   :  { %372 = vmatprep.subr.bf16.mxu0 %v530_v0  ;;  %392 = vmatprep.subr.bf16.mxu1 %v530_v0 }
  0x4e   :  { %373 = vmatpush3.bf16.msra.mxu0 %v417_v9  ;;  %393 = vmatpush3.bf16.msra.mxu1 %v426_v14 }
  0x4f   :  { %374 = vmatprep.subr.bf16.mxu0 %v530_v0  ;;  %394 = vmatprep.subr.bf16.mxu1 %v530_v0 }
  0x52   :  { %375 = vmatpush3.bf16.msra.mxu0 %v418_v11  ;;  %395 = vmatpush3.bf16.msra.mxu1 %v427_v16 }
  0x53   :  { %376 = vmatprep.subr.bf16.mxu0 %v530_v0  ;;  %396 = vmatprep.subr.bf16.mxu1 %v530_v0 }
  0x56   :  { %377 = vmatpush3.bf16.msra.mxu0 %v419_v13  ;;  %397 = vmatpush3.bf16.msra.mxu1 %v428_v17 }
  0x59   :  { %379 = vmatmul.mubr.bf16.vlgmr.msra.gmra.mrb[0].mxu0 %v420_v15 }
 0x12c   :  { %v179_v19 = vpop.f32.mrb[0].mxu0 }
 0x12d   :  { %v180_v20 = vadd.f32 %v325_v18, %v179_v19  ;;  %v380_v21 = vpop.f32.mrb[1].mxu0 }
 0x12e   :  { %v182_v22 = vpop.f32.mrb[2].mxu0 }
 0x12f   :  { %v183_v23 = vadd.f32 %v325_v18, %v182_v22  ;;  %v381_v24 = vpop.f32.mrb[3].mxu0  ;;  %v186_v25 = vmax.f32 %v180_v20, 0.0 }
 0x131   :  { %v187_v26 = vmax.f32 %v183_v23, 0.0 }
 0x133   :  { %v188_v27 = vpack.c.bf16 %v187_v26, %v186_v25 }
 0x135   :  { %399 = vmatmul.mubr.bf16.vlgmr.msra.gmra.mrb[0].mxu1 %v188_v27 }
 0x208   :  { %v294_v29 = vpop.f32.mrb[0].mxu1 }
 0x209   :  { %v295_v31 = vadd.f32 %v335_v28, %v294_v29  ;;  %v400_v32 = vpop.f32.mrb[1].mxu1 }
 0x20a   :  { %v297_v33 = vpop.f32.mrb[2].mxu1 }
 0x20b   :  { %v303_v35 = vadd.f32 %v301_v30, %v295_v31  ;;  %v298_v36 = vadd.f32 %v335_v28, %v297_v33  ;;  %v401_v37 = vpop.f32.mrb[3].mxu1 }
 0x20d   :  { %305 = vst [vmem:[#allocation8] sm:$0xff] %v303_v35  ;;  %v304_v38 = vadd.f32 %v302_v34, %v298_v36 }
 0x20f   :  { %306 = vst [vmem:[#allocation8 + $0x8] sm:$0xff] %v304_v38 }
 0x210   :  { %506 = shalt.err (!%p503_p0)
}
 0x211   :  { %s507_s18 = scalar_lea.hbm %s643_s6, 256 }
 0x212   :  { %p508_p1 = scmp.ne.s32.totalorder %s643_s6, %s507_s18  ;;  %p511_p2 = scmp.lt.u32.totalorder %s507_s18, %s643_s6 }
 0x214   :  { %p513_p3 = pnand %p511_p2, %p508_p1 }
 0x216   :  { %516 = shalt.err (!%p513_p3)
}
 0x217   :  { %318 = dma.vmem_to_hbm [thread:$0]  %s313_s15, 256, %s643_s6, [#allocation4], %s527_s2, %s527_s2, %s528_s21  }
 0x218   :  { %521 = dma.done.wait [#allocation4], 256  }
 0x219   :  { %522 = vsyncadd [#allocation4], 4294967040 }
 0x21a   :  { %322 = vsyncpa [#allocation3], 1 }
 0x21b   :  { %323 = vsyncpa [#allocation6], 1 }
 0x21c   :  { %324 = vsyncpa [#allocation4], 1 }

</bundles_post_ra>
